<compile_context>
chip_gen: v7x
topology: tpu7x:2x2x1
jax: 0.10.0
libtpu: 0.0.40
codegen_flags: <defaults>
</compile_context>

<pallas_src>
import functools

import jax
import jax.numpy as jnp
from jax.experimental import pallas as pl
from jax.experimental.pallas import tpu as pltpu

LANE = 128          # TPU lane width; feature dims are padded to a multiple of this
_NEG_BIG = -1e30    # bias fill for padded logit columns (exp() underflows to 0)


def _round_up(x, m):
    return ((x + m - 1) // m) * m


def _pad2(a, rows, cols, fill=0.0):
    r, c = a.shape
    return jnp.pad(a, ((0, rows - r), (0, cols - c)), constant_values=fill)


# ---------------------------------------------------------------------------
# Pallas kernels
# ---------------------------------------------------------------------------
def _gcn_fused_kernel(a_ref, x_ref, w1_ref, b1_ref, w2_ref, b2_ref,
                      wot_ref, bo_ref, o_ref):
    """Whole GCN forward in a single kernel (everything resident in VMEM).

    A, X and all weights arrive as bf16 (MXU-native input); every matmul
    accumulates in f32 and the softmax path is f32.
    """
    a = a_ref[...]                                                       # bf16 [NP, NP]
    # --- conv1: relu(A @ (X @ W1) + b1) ---
    xw1 = jnp.dot(x_ref[...], w1_ref[...], preferred_element_type=jnp.float32)
    h1 = jnp.dot(a, xw1.astype(jnp.bfloat16), preferred_element_type=jnp.float32)
    h1 = jnp.maximum(h1 + b1_ref[...], 0.0)
    # TODO(synk): F.dropout(training=self.training) — identity in eval mode, not implemented.
    # --- conv2: A @ (h1 @ W2) + b2 ---
    xw2 = jnp.dot(h1.astype(jnp.bfloat16), w2_ref[...],
                  preferred_element_type=jnp.float32)
    h2 = jnp.dot(a, xw2.astype(jnp.bfloat16),
                 preferred_element_type=jnp.float32) + b2_ref[...]
    # --- output Linear (W_out pre-transposed) + log_softmax(dim=1) ---
    logits = jnp.dot(h2.astype(jnp.bfloat16), wot_ref[...],
                     preferred_element_type=jnp.float32) + bo_ref[...]
    m = jnp.max(logits, axis=1, keepdims=True)
    z = logits - m
    lse = jnp.log(jnp.sum(jnp.exp(z), axis=1, keepdims=True))
    o_ref[...] = (z - lse).astype(o_ref.dtype)


def _xw_kernel(x_ref, w_ref, o_ref):
    # Row tile of X @ W; emitted in bf16 so the following A-tile matmul feeds
    # the MXU directly.
    o_ref[...] = jnp.dot(x_ref[...], w_ref[...],
                         preferred_element_type=jnp.float32).astype(o_ref.dtype)


def _spmm_bias_kernel(a_ref, xw_ref, b_ref, o_ref, *, apply_relu):
    # Row tile of A_norm @ XW + b (optionally ReLU).
    out = jnp.dot(a_ref[...], xw_ref[...],
                  preferred_element_type=jnp.float32) + b_ref[...]
    if apply_relu:
        out = jnp.maximum(out, 0.0)
    o_ref[...] = out.astype(o_ref.dtype)


def _linear_logsoftmax_kernel(x_ref, wt_ref, b_ref, o_ref):
    # Row tile of X @ W_out^T + b, then log_softmax over the lane axis.
    logits = jnp.dot(x_ref[...], wt_ref[...],
                     preferred_element_type=jnp.float32) + b_ref[...]
    m = jnp.max(logits, axis=1, keepdims=True)
    z = logits - m
    lse = jnp.log(jnp.sum(jnp.exp(z), axis=1, keepdims=True))
    o_ref[...] = (z - lse).astype(o_ref.dtype)


# ---------------------------------------------------------------------------
# pallas_call wrappers
# ---------------------------------------------------------------------------
_VMEM = pl.BlockSpec(memory_space=pltpu.MemorySpace.VMEM)


def _gcn_forward_fused(a_p, x_p, prep):
    """Single fused pallas_call: valid when the padded problem fits in VMEM."""
    np_ = a_p.shape[0]
    inp, h1p, h2p, outp = prep["pdims"]
    flops = 2 * np_ * (inp * h1p + np_ * h1p + h1p * h2p + np_ * h2p + h2p * outp)
    bytes_accessed = (2 * np_ * np_ + 2 * np_ * inp
                      + 2 * (inp * h1p + h1p * h2p + h2p * outp)
                      + 4 * (h1p + h2p + outp) + 4 * np_ * outp)
    return pl.pallas_call(
        _gcn_fused_kernel,
        out_shape=jax.ShapeDtypeStruct((np_, outp), jnp.float32),
        in_specs=[_VMEM] * 8,
        out_specs=_VMEM,
        cost_estimate=pl.CostEstimate(flops=flops,
                                      transcendentals=np_ * outp + np_,
                                      bytes_accessed=bytes_accessed),
    )(a_p, x_p, prep["w1"], prep["b1"], prep["w2"], prep["b2"],
      prep["w_out_t"], prep["b_out"])


def _dense_xw_tiled(x, w, *, tm):
    """Row-tiled X @ W (small, fully parallel over row tiles)."""
    n, fin = x.shape
    fout = w.shape[1]
    return pl.pallas_call(
        _xw_kernel,
        out_shape=jax.ShapeDtypeStruct((n, fout), jnp.bfloat16),
        grid_spec=pltpu.PrefetchScalarGridSpec(
            num_scalar_prefetch=0, grid=(n // tm,),
            in_specs=[pl.BlockSpec((tm, fin), lambda i: (i, 0)),
                      pl.BlockSpec((fin, fout), lambda i: (0, 0))],
            out_specs=pl.BlockSpec((tm, fout), lambda i: (i, 0))),
        compiler_params=pltpu.CompilerParams(dimension_semantics=("parallel",)),
    )(x, w)


def _spmm_bias_tiled(a, xw, b, *, apply_relu, tm, out_dtype=jnp.bfloat16):
    """Row-tiled A_norm @ XW + b: streams (tm, N) tiles of A, XW stays resident."""
    n = a.shape[0]
    fout = xw.shape[1]
    kern = functools.partial(_spmm_bias_kernel, apply_relu=apply_relu)
    return pl.pallas_call(
        kern,
        out_shape=jax.ShapeDtypeStruct((n, fout), out_dtype),
        grid_spec=pltpu.PrefetchScalarGridSpec(
            num_scalar_prefetch=0, grid=(n // tm,),
            in_specs=[pl.BlockSpec((tm, n), lambda i: (i, 0)),
                      pl.BlockSpec((n, fout), lambda i: (0, 0)),
                      pl.BlockSpec((1, fout), lambda i: (0, 0))],
            out_specs=pl.BlockSpec((tm, fout), lambda i: (i, 0))),
        # "parallel" lets v7x shard the independent row tiles across both TCs.
        compiler_params=pltpu.CompilerParams(dimension_semantics=("parallel",)),
        cost_estimate=pl.CostEstimate(
            flops=2 * n * n * fout, transcendentals=0,
            bytes_accessed=2 * n * n + 2 * n * fout + 4 * fout + 2 * n * fout),
    )(a, xw, b)


def _linear_log_softmax_tiled(x, wt, b, *, tm):
    n, fin = x.shape
    fout = wt.shape[1]
    return pl.pallas_call(
        _linear_logsoftmax_kernel,
        out_shape=jax.ShapeDtypeStruct((n, fout), jnp.float32),
        grid_spec=pltpu.PrefetchScalarGridSpec(
            num_scalar_prefetch=0, grid=(n // tm,),
            in_specs=[pl.BlockSpec((tm, fin), lambda i: (i, 0)),
                      pl.BlockSpec((fin, fout), lambda i: (0, 0)),
                      pl.BlockSpec((1, fout), lambda i: (0, 0))],
            out_specs=pl.BlockSpec((tm, fout), lambda i: (i, 0))),
        compiler_params=pltpu.CompilerParams(dimension_semantics=("parallel",)),
    )(x, wt, b)


def _gcn_forward_tiled(a_p, x_p, prep, *, tm):
    """Scalable path: A is streamed in (tm, N) row tiles, features stay resident."""
    h = _dense_xw_tiled(x_p, prep["w1"], tm=tm)
    h = _spmm_bias_tiled(a_p, h, prep["b1"], apply_relu=True, tm=tm)
    h = _dense_xw_tiled(h, prep["w2"], tm=tm)
    h = _spmm_bias_tiled(a_p, h, prep["b2"], apply_relu=False, tm=tm)
    return _linear_log_softmax_tiled(h, prep["w_out_t"], prep["b_out"], tm=tm)


# ---------------------------------------------------------------------------
# Plain-JAX glue (one-time prep; reused across forward calls)
# ---------------------------------------------------------------------------
def gcn_norm_dense(edge_index, edge_weight, num_nodes):
    """Dense D^-1/2 (A + I) D^-1/2 matching PyG gcn_norm (add_remaining_self_loops:
    existing self-loop weights are kept, missing ones get weight 1)."""
    src = edge_index[0]
    dst = edge_index[1]
    if edge_weight is None:
        edge_weight = jnp.ones(src.shape[0], dtype=jnp.float32)
    self_mask = src == dst
    off_w = jnp.where(self_mask, 0.0, edge_weight)
    a = jnp.zeros((num_nodes, num_nodes), jnp.float32).at[dst, src].add(off_w)
    loop_w = jnp.ones((num_nodes,), jnp.float32)
    loop_w = loop_w.at[jnp.where(self_mask, src, num_nodes)].set(
        jnp.where(self_mask, edge_weight, 0.0), mode="drop")
    a = a + jnp.diag(loop_w)
    deg = jnp.sum(a, axis=1)
    dinv = jnp.where(deg > 0, 1.0 / jnp.sqrt(deg), 0.0)
    return dinv[:, None] * a * dinv[None, :]


def prepare_adjacency(edge_index, edge_weight, num_nodes, n_pad):
    """Build the normalized adjacency once, pad to n_pad and cast to bf16."""
    a = gcn_norm_dense(edge_index, edge_weight, num_nodes)
    return _pad2(a, n_pad, n_pad).astype(jnp.bfloat16)


def prepare_params(params):
    """Pad feature dims to lane-dense widths, cast weights to bf16 and
    pre-transpose W_out once (so no per-call transpose op)."""
    in_dim, hid = params["w1"].shape
    hid1 = params["w2"].shape[1]
    out_dim = params["w_out"].shape[0]
    inp, h1p, h2p, outp = (_round_up(d, LANE) for d in (in_dim, hid, hid1, out_dim))
    return {
        "w1": _pad2(params["w1"], inp, h1p).astype(jnp.bfloat16),
        "b1": _pad2(params["b1"].reshape(1, -1), 1, h1p),
        "w2": _pad2(params["w2"], h1p, h2p).astype(jnp.bfloat16),
        "b2": _pad2(params["b2"].reshape(1, -1), 1, h2p),
        "w_out_t": _pad2(params["w_out"].T, h2p, outp).astype(jnp.bfloat16),
        # padded logit columns get a huge negative bias -> exp() == 0 in softmax
        "b_out": _pad2(params["b_out"].reshape(1, -1), 1, outp, fill=_NEG_BIG),
        "dims": (in_dim, hid, hid1, out_dim),
        "pdims": (inp, h1p, h2p, outp),
    }


def init_params(key, in_dim, hid_dim, hid_dim1, out_dim):
    k1, k2, k3 = jax.random.split(key, 3)
    return {
        "w1": jax.random.normal(k1, (in_dim, hid_dim), jnp.float32) * 0.1,
        "b1": jnp.zeros((hid_dim,), jnp.float32),
        "w2": jax.random.normal(k2, (hid_dim, hid_dim1), jnp.float32) * 0.1,
        "b2": jnp.zeros((hid_dim1,), jnp.float32),
        "w_out": jax.random.normal(k3, (out_dim, hid_dim1), jnp.float32) * 0.1,
        "b_out": jnp.zeros((out_dim,), jnp.float32),
        # mask_embedding exists in __init__ but is unused by the plain forward()
        "mask_embedding": jnp.zeros((1, in_dim), jnp.float32),
    }


def gcn_forward(prep, a_norm_p, x, *, tiled=None, tm=128):
    """Equivalent of GCN.forward (eval mode). a_norm_p: padded bf16 [NP, NP]."""
    n = x.shape[0]
    out_dim = prep["dims"][3]
    inp = prep["pdims"][0]
    np_ = a_norm_p.shape[0]
    x_p = _pad2(x.astype(jnp.float32), np_, inp).astype(jnp.bfloat16)
    if tiled is None:
        # fused whole-array path needs A (+ intermediates) resident in VMEM;
        # switch to row tiling when A alone would crowd the scoped VMEM default
        # (16 MiB on v5e, 32 MiB on v6e/v7x).
        tiled = (2 * np_ * np_) > (8 << 20)
    if tiled:
        out_p = _gcn_forward_tiled(a_norm_p, x_p, prep, tm=tm)
    else:
        out_p = _gcn_forward_fused(a_norm_p, x_p, prep)
    return out_p[:n, :out_dim]


def gcn_reference(params, x, edge_index, edge_weight=None):
    """Pure f32 JAX reference of the PyTorch forward()."""
    n = x.shape[0]
    a = gcn_norm_dense(edge_index, edge_weight, n)
    h = jnp.maximum(a @ (x @ params["w1"]) + params["b1"][None, :], 0.0)
    h = a @ (h @ params["w2"]) + params["b2"][None, :]
    logits = h @ params["w_out"].T + params["b_out"][None, :]
    return jax.nn.log_softmax(logits, axis=1)


# ---------------------------------------------------------------------------
if __name__ == "__main__":
    N, E = 16, 40                       # nodes, edges
    IN_DIM, HID_DIM, HID_DIM1, OUT_DIM = 8, 32, 16, 4
    TM = 128                            # row tile (safe for v5e/v7x VMEM defaults;
                                        # can be raised to 256+ on v6e with
                                        # vmem_limit_bytes headroom)

    key = jax.random.PRNGKey(0)
    k_x, k_e, k_p = jax.random.split(key, 3)

    x = jax.random.normal(k_x, (N, IN_DIM), jnp.float32)
    edge_index = jax.random.randint(k_e, (2, E), 0, N, dtype=jnp.int32)
    params = init_params(k_p, IN_DIM, HID_DIM, HID_DIM1, OUT_DIM)

    # one-time prep: adjacency + padded/cast params are static across forwards
    NP = max(_round_up(N, TM), TM)
    a_p = prepare_adjacency(edge_index, None, N, NP)
    prep = prepare_params(params)

    out_fused = gcn_forward(prep, a_p, x, tiled=False)        # single fused call
    out_tiled = gcn_forward(prep, a_p, x, tiled=True, tm=TM)  # row-tiled path
    out_fused, out_tiled = jax.block_until_ready((out_fused, out_tiled))

    ref = gcn_reference(params, x, edge_index)

    assert out_fused.shape == (N, OUT_DIM)
    assert bool(jnp.all(jnp.isfinite(out_fused)))
    # rows of log_softmax must exp-sum to 1
    assert jnp.allclose(jnp.sum(jnp.exp(out_fused), axis=1), 1.0, atol=1e-3)
    # both kernel paths agree with each other and with the f32 reference
    assert jnp.allclose(out_fused, out_tiled, atol=1e-2)
    assert jnp.allclose(out_fused, ref, atol=5e-2)
    print("KERNEL_OK")
</pallas_src>

<mosaic_0001>
module attributes {stable_mosaic.version = 11 : i64} {
  func.func @_gcn_fused_kernel(%arg0: memref<128x128xbf16, #tpu.memory_space<vmem>>, %arg1: memref<128x128xbf16, #tpu.memory_space<vmem>>, %arg2: memref<128x128xbf16, #tpu.memory_space<vmem>>, %arg3: memref<1x128xf32, #tpu.memory_space<vmem>>, %arg4: memref<128x128xbf16, #tpu.memory_space<vmem>>, %arg5: memref<1x128xf32, #tpu.memory_space<vmem>>, %arg6: memref<128x128xbf16, #tpu.memory_space<vmem>>, %arg7: memref<1x128xf32, #tpu.memory_space<vmem>>, %arg8: memref<128x128xf32, #tpu.memory_space<vmem>>) attributes {dimension_semantics = [], scalar_prefetch = 0 : i64, scratch_operands = 0 : i64, tpu.core_type = #tpu.core_type<tc>} {
    %c0 = arith.constant 0 : index
    %c0_0 = arith.constant 0 : index
    %0 = vector.load %arg0[%c0, %c0_0] : memref<128x128xbf16, #tpu.memory_space<vmem>>, vector<128x128xbf16>
    %c0_1 = arith.constant 0 : index
    %c0_2 = arith.constant 0 : index
    %1 = vector.load %arg1[%c0_1, %c0_2] : memref<128x128xbf16, #tpu.memory_space<vmem>>, vector<128x128xbf16>
    %c0_3 = arith.constant 0 : index
    %c0_4 = arith.constant 0 : index
    %2 = vector.load %arg2[%c0_3, %c0_4] : memref<128x128xbf16, #tpu.memory_space<vmem>>, vector<128x128xbf16>
    %cst = arith.constant dense<0.000000e+00> : vector<128x128xf32>
    %3 = tpu.matmul %1, %2, %cst {dimension_numbers = #tpu.dot_dimension_numbers<[1], [0], [0], [1], [0, 0, 1, 1], [], []>} : vector<128x128xbf16>, vector<128x128xbf16>, vector<128x128xf32> -> vector<128x128xf32>
    %4 = arith.truncf %3 : vector<128x128xf32> to vector<128x128xbf16>
    %cst_5 = arith.constant dense<0.000000e+00> : vector<128x128xf32>
    %5 = tpu.matmul %0, %4, %cst_5 {dimension_numbers = #tpu.dot_dimension_numbers<[1], [0], [0], [1], [0, 0, 1, 1], [], []>} : vector<128x128xbf16>, vector<128x128xbf16>, vector<128x128xf32> -> vector<128x128xf32>
    %c0_6 = arith.constant 0 : index
    %c0_7 = arith.constant 0 : index
    %6 = vector.load %arg3[%c0_6, %c0_7] : memref<1x128xf32, #tpu.memory_space<vmem>>, vector<1x128xf32>
    %7 = vector.broadcast %6 : vector<1x128xf32> to vector<128x128xf32>
    %8 = arith.addf %5, %7 : vector<128x128xf32>
    %cst_8 = arith.constant 0.000000e+00 : f32
    %9 = vector.broadcast %cst_8 : f32 to vector<128x128xf32>
    %10 = arith.maximumf %8, %9 : vector<128x128xf32>
    %11 = arith.truncf %10 : vector<128x128xf32> to vector<128x128xbf16>
    %c0_9 = arith.constant 0 : index
    %c0_10 = arith.constant 0 : index
    %12 = vector.load %arg4[%c0_9, %c0_10] : memref<128x128xbf16, #tpu.memory_space<vmem>>, vector<128x128xbf16>
    %cst_11 = arith.constant dense<0.000000e+00> : vector<128x128xf32>
    %13 = tpu.matmul %11, %12, %cst_11 {dimension_numbers = #tpu.dot_dimension_numbers<[1], [0], [0], [1], [0, 0, 1, 1], [], []>} : vector<128x128xbf16>, vector<128x128xbf16>, vector<128x128xf32> -> vector<128x128xf32>
    %14 = arith.truncf %13 : vector<128x128xf32> to vector<128x128xbf16>
    %cst_12 = arith.constant dense<0.000000e+00> : vector<128x128xf32>
    %15 = tpu.matmul %0, %14, %cst_12 {dimension_numbers = #tpu.dot_dimension_numbers<[1], [0], [0], [1], [0, 0, 1, 1], [], []>} : vector<128x128xbf16>, vector<128x128xbf16>, vector<128x128xf32> -> vector<128x128xf32>
    %c0_13 = arith.constant 0 : index
    %c0_14 = arith.constant 0 : index
    %16 = vector.load %arg5[%c0_13, %c0_14] : memref<1x128xf32, #tpu.memory_space<vmem>>, vector<1x128xf32>
    %17 = vector.broadcast %16 : vector<1x128xf32> to vector<128x128xf32>
    %18 = arith.addf %15, %17 : vector<128x128xf32>
    %19 = arith.truncf %18 : vector<128x128xf32> to vector<128x128xbf16>
    %c0_15 = arith.constant 0 : index
    %c0_16 = arith.constant 0 : index
    %20 = vector.load %arg6[%c0_15, %c0_16] : memref<128x128xbf16, #tpu.memory_space<vmem>>, vector<128x128xbf16>
    %cst_17 = arith.constant dense<0.000000e+00> : vector<128x128xf32>
    %21 = tpu.matmul %19, %20, %cst_17 {dimension_numbers = #tpu.dot_dimension_numbers<[1], [0], [0], [1], [0, 0, 1, 1], [], []>} : vector<128x128xbf16>, vector<128x128xbf16>, vector<128x128xf32> -> vector<128x128xf32>
    %c0_18 = arith.constant 0 : index
    %c0_19 = arith.constant 0 : index
    %22 = vector.load %arg7[%c0_18, %c0_19] : memref<1x128xf32, #tpu.memory_space<vmem>>, vector<1x128xf32>
    %23 = vector.broadcast %22 : vector<1x128xf32> to vector<128x128xf32>
    %24 = arith.addf %21, %23 : vector<128x128xf32>
    %cst_20 = arith.constant dense<0xFF800000> : vector<128xf32>
    %25 = vector.multi_reduction <maximumf>, %24, %cst_20 [1] : vector<128x128xf32> to vector<128xf32>
    %26 = vector.shape_cast %25 : vector<128xf32> to vector<128x1xf32>
    %27 = vector.broadcast %26 : vector<128x1xf32> to vector<128x128xf32>
    %28 = arith.subf %24, %27 : vector<128x128xf32>
    %29 = math.exp %28 : vector<128x128xf32>
    %cst_21 = arith.constant dense<0.000000e+00> : vector<128xf32>
    %30 = vector.multi_reduction <add>, %29, %cst_21 [1] : vector<128x128xf32> to vector<128xf32>
    %31 = vector.shape_cast %30 : vector<128xf32> to vector<128x1xf32>
    %32 = math.log %31 : vector<128x1xf32>
    %33 = vector.broadcast %32 : vector<128x1xf32> to vector<128x128xf32>
    %34 = arith.subf %28, %33 : vector<128x128xf32>
    %c0_22 = arith.constant 0 : index
    %c0_23 = arith.constant 0 : index
    %35 = vector.load %arg8[%c0_22, %c0_23] : memref<128x128xf32, #tpu.memory_space<vmem>>, vector<128x128xf32>
    tpu.vector_store %arg8[%c0_22, %c0_23], %34 {strides = array<i32>} : memref<128x128xf32, #tpu.memory_space<vmem>>, vector<128x128xf32>,
    return
  }
}

</mosaic_0001>

<bundles_post_ra>
// kernel: tpu_custom_call.1
= control target key start
LH: loop header
LB: loop body
LE: loop exit
PB: predicated region body
PF: predicated region fallthrough
CT: control target
= control target key end

     0   :  { %13 = vsyncpa [#allocation3], 0  ;;  %s2002_s0 = inlined_call_operand.hbm [shape: bf16[128,128], index: 0, kind: input, shape index: {}]   ;;  %s2003_s1 = inlined_call_operand.hbm [shape: bf16[128,128], index: 1, kind: input, shape index: {}]   ;;  %s2004_s2 = inlined_call_operand.hbm [shape: bf16[128,128], index: 2, kind: input, shape index: {}]   ;;  %s2005_s3 = inlined_call_operand.vmem [shape: f32[1,128], index: 3, kind: input, shape index: {}]   ;;  %s2006_s4 = inlined_call_operand.hbm [shape: bf16[128,128], index: 4, kind: input, shape index: {}]   ;;  %s2007_s5 = inlined_call_operand.vmem [shape: f32[1,128], index: 5, kind: input, shape index: {}]   ;;  %s2008_s6 = inlined_call_operand.hbm [shape: bf16[128,128], index: 6, kind: input, shape index: {}]   ;;  %s2009_s7 = inlined_call_operand.vmem [shape: f32[1,128], index: 7, kind: input, shape index: {}]   ;;  %s2010_s8 = inlined_call_operand.hbm [shape: f32[128,128], index: 8, kind: output, shape index: {}]  }
   0x1   :  { %14 = vsyncpa [#allocation6], 0 }
   0x2   :  { %15 = vsyncpa [#allocation9], 0 }
   0x3   :  { %16 = vsyncpa [#allocation4], 0  ;;  %s1721_s27 = smov [#allocation5]   ;;  %s1722_s29 = smov [#allocation8]  }
   0x4   :  { %s34_s28 = sshll.u32 %s1721_s27, 4  ;;  %s60_s30 = sshll.u32 %s1722_s29, 4  ;;  %s35_s28 = int_to_ptr.vmem [resolvable:$true] %s34_s28  ;;  %s1776_s30 = int_to_ptr.vmem [resolvable:$true] %s60_s30 }
   0x5   :  { %s1581_s11 = scalar_lea.hbm %s2003_s1, 1024 }
   0x6   :  { %p1582_p0 = scmp.ne.s32.totalorder %s2003_s1, %s1581_s11  ;;  %p1585_p1 = scmp.lt.u32.totalorder %s1581_s11, %s2003_s1 }
   0x8   :  { %p1587_p2 = pnand %p1585_p1, %p1582_p0 }
   0xa   :  { %1590 = shalt.err (!%p1587_p2)
}
   0xb   :  { %s1591_s16 = scalar_lea.vmem %s35_s28, 1024  ;;  %p1596_p4 = scmp.lt.s32.totalorder %s35_s28, %s35_s28 }
   0xc   :  { %p1592_p3 = scmp.ne.s32.totalorder %s35_s28, %s1591_s16  ;;  %p1597_p5 = scmp.lt.s32.totalorder %s1591_s16, %s1591_s16 }
   0xe   :  { %p1598_p6 = por %p1597_p5, %p1596_p4 }
  0x10   :  { %p1599_p7 = pnand %p1598_p6, %p1592_p3 }
  0x12   :  { %1602 = shalt.err (!%p1599_p7)
}
  0x13   :  { %s1723_s17 = smov 64   ;;  %s1724_s18 = smov 4  }
  0x14   :  { %40 = dma.hbm_to_vmem [thread:$0]  %s2003_s1, 1024, %s35_s28, [#allocation6], %s1723_s17, %s1723_s17, %s1724_s18  }
  0x15   :  { %s1603_s23 = scalar_lea.hbm %s2006_s4, 1024 }
  0x16   :  { %p1604_p8 = scmp.ne.s32.totalorder %s2006_s4, %s1603_s23  ;;  %p1607_p9 = scmp.lt.u32.totalorder %s1603_s23, %s2006_s4 }
  0x18   :  { %p1609_p10 = pnand %p1607_p9, %p1604_p8 }
  0x1a   :  { %1612 = shalt.err (!%p1609_p10)
}
  0x1b   :  { %s1613_s29 = scalar_lea.vmem %s1776_s30, 1024  ;;  %p1618_p12 = scmp.lt.s32.totalorder %s1776_s30, %s1776_s30 }
  0x1c   :  { %p1614_p11 = scmp.ne.s32.totalorder %s1776_s30, %s1613_s29  ;;  %p1619_p13 = scmp.lt.s32.totalorder %s1613_s29, %s1613_s29 }
  0x1e   :  { %p1620_p0 = por %p1619_p13, %p1618_p12 }
  0x20   :  { %p1621_p1 = pnand %p1620_p0, %p1614_p11 }
  0x22   :  { %1624 = shalt.err (!%p1621_p1)
}
  0x23   :  { %66 = dma.hbm_to_vmem [thread:$0]  %s2006_s4, 1024, %s1776_s30, [#allocation9], %s1723_s17, %s1723_s17, %s1724_s18  }
  0x24   :  { %s1725_s9 = smov [#allocation2]   ;;  %s1726_s11 = smov [#allocation7]  }
  0x25   :  { %s22_s10 = sshll.u32 %s1725_s9, 4  ;;  %s46_s12 = sshll.u32 %s1726_s11, 4  ;;  %s23_s10 = int_to_ptr.vmem [resolvable:$true] %s22_s10  ;;  %s1813_s12 = int_to_ptr.vmem [resolvable:$true] %s46_s12 }
  0x26   :  { %s1625_s15 = scalar_lea.hbm %s2002_s0, 1024 }
  0x27   :  { %p1626_p2 = scmp.ne.s32.totalorder %s2002_s0, %s1625_s15  ;;  %p1629_p3 = scmp.lt.u32.totalorder %s1625_s15, %s2002_s0 }
  0x29   :  { %p1631_p4 = pnand %p1629_p3, %p1626_p2 }
  0x2b   :  { %1634 = shalt.err (!%p1631_p4)
}
  0x2c   :  { %s1635_s4 = scalar_lea.vmem %s23_s10, 1024  ;;  %p1640_p6 = scmp.lt.s32.totalorder %s23_s10, %s23_s10 }
  0x2d   :  { %p1636_p5 = scmp.ne.s32.totalorder %s23_s10, %s1635_s4  ;;  %p1641_p7 = scmp.lt.s32.totalorder %s1635_s4, %s1635_s4 }
  0x2f   :  { %p1642_p8 = por %p1641_p7, %p1640_p6 }
  0x31   :  { %p1643_p9 = pnand %p1642_p8, %p1636_p5 }
  0x33   :  { %1646 = shalt.err (!%p1643_p9)
}
  0x34   :  { %28 = dma.hbm_to_vmem [thread:$0]  %s2002_s0, 1024, %s23_s10, [#allocation3], %s1723_s17, %s1723_s17, %s1724_s18  }
  0x35   :  { %s1647_s25 = scalar_lea.hbm %s2004_s2, 1024 }
  0x36   :  { %p1648_p10 = scmp.ne.s32.totalorder %s2004_s2, %s1647_s25  ;;  %p1651_p11 = scmp.lt.u32.totalorder %s1647_s25, %s2004_s2 }
  0x38   :  { %p1653_p12 = pnand %p1651_p11, %p1648_p10 }
  0x3a   :  { %1656 = shalt.err (!%p1653_p12)
}
  0x3b   :  { %s1657_s28 = scalar_lea.vmem %s1813_s12, 1024  ;;  %p1662_p0 = scmp.lt.s32.totalorder %s1813_s12, %s1813_s12 }
  0x3c   :  { %p1658_p13 = scmp.ne.s32.totalorder %s1813_s12, %s1657_s28  ;;  %p1663_p1 = scmp.lt.s32.totalorder %s1657_s28, %s1657_s28 }
  0x3e   :  { %p1664_p2 = por %p1663_p1, %p1662_p0 }
  0x40   :  { %p1665_p3 = pnand %p1664_p2, %p1658_p13 }
  0x42   :  { %1668 = shalt.err (!%p1665_p3)
}
  0x43   :  { %52 = dma.hbm_to_vmem [thread:$0]  %s2004_s2, 1024, %s1813_s12, [#allocation6], %s1723_s17, %s1723_s17, %s1724_s18  }
  0x44   :  { %s1727_s10 = smov [#allocation10]   ;;  %s1669_s15 = scalar_lea.hbm %s2008_s6, 1024 }
  0x45   :  { %s74_s11 = sshll.u32 %s1727_s10, 4  ;;  %p1670_p4 = scmp.ne.s32.totalorder %s2008_s6, %s1669_s15  ;;  %s75_s11 = int_to_ptr.vmem [resolvable:$true] %s74_s11 }
  0x46   :  { %p1673_p5 = scmp.lt.u32.totalorder %s1669_s15, %s2008_s6 }
  0x48   :  { %p1675_p6 = pnand %p1673_p5, %p1670_p4 }
  0x4a   :  { %1678 = shalt.err (!%p1675_p6)
}
  0x4b   :  { %s1679_s4 = scalar_lea.vmem %s75_s11, 1024  ;;  %p1684_p8 = scmp.lt.s32.totalorder %s75_s11, %s75_s11 }
  0x4c   :  { %p1680_p7 = scmp.ne.s32.totalorder %s75_s11, %s1679_s4  ;;  %p1685_p9 = scmp.lt.s32.totalorder %s1679_s4, %s1679_s4 }
  0x4e   :  { %p1686_p10 = por %p1685_p9, %p1684_p8 }
  0x50   :  { %p1687_p11 = pnand %p1686_p10, %p1680_p7 }
  0x52   :  { %1690 = shalt.err (!%p1687_p11)
}
  0x53   :  { %80 = dma.hbm_to_vmem [thread:$0]  %s2008_s6, 1024, %s75_s11, [#allocation9], %s1723_s17, %s1723_s17, %s1724_s18  }
  0x54   :  { %1713 = dma.done.wait [#allocation3], 1024  }
  0x55   :  { %1714 = vsyncadd [#allocation3], 4294966272 }
  0x56   :  { %1715 = dma.done.wait [#allocation6], 2048  }
  0x57   :  { %1716 = vsyncadd [#allocation6], 4294965248 }
  0x58   :  { %1717 = dma.done.wait [#allocation9], 2048  }
  0x59   :  { %1718 = vsyncadd [#allocation9], 4294965248  ;;  %v1477_v0 = vld [vmem:[#allocation7] sm:$0xff]   ;;  %v1478_v1 = vld [vmem:[#allocation7 + $0x8] sm:$0xff]  }
  0x5a   :  { %1291 = vmatprep.subr.bf16.mxu0 %v1477_v0  ;;  %v1479_v2 = vld [vmem:[#allocation7 + $0x10] sm:$0xff]   ;;  %v1480_v3 = vld [vmem:[#allocation7 + $0x18] sm:$0xff]   ;;  %v1485_v4 = vld [vmem:[#allocation5] sm:$0xff]  }
  0x5b   :  { %1292 = vmatpush3.bf16.msra.mxu0 %v1477_v0  ;;  %1307 = vmatprep.mubr.bf16.mxu0 %v1485_v4  ;;  %v1481_v5 = vld [vmem:[#allocation7 + $0x20] sm:$0xff]   ;;  %v1482_v6 = vld [vmem:[#allocation7 + $0x28] sm:$0xff]   ;;  %v1483_v7 = vld [vmem:[#allocation7 + $0x30] sm:$0xff]  }
  0x5c   :  { %1293 = vmatprep.subr.bf16.mxu0 %v1478_v1  ;;  %v1484_v8 = vld [vmem:[#allocation7 + $0x38] sm:$0xff]   ;;  %v1486_v9 = vld [vmem:[#allocation5 + $0x8] sm:$0xff]   ;;  %v1487_v10 = vld [vmem:[#allocation5 + $0x10] sm:$0xff]  }
  0x5d   :  { %v1488_v11 = vld [vmem:[#allocation5 + $0x18] sm:$0xff]   ;;  %v1489_v12 = vld [vmem:[#allocation5 + $0x20] sm:$0xff]   ;;  %v1490_v13 = vld [vmem:[#allocation5 + $0x28] sm:$0xff]  }
  0x5e   :  { %v1491_v14 = vld [vmem:[#allocation5 + $0x30] sm:$0xff]   ;;  %v1492_v15 = vld [vmem:[#allocation5 + $0x38] sm:$0xff]   ;;  %v1865_v16 = vld [vmem:[#allocation2] sm:$0xff]  }
  0x5f   :  { %1294 = vmatpush3.bf16.msra.mxu0 %v1478_v1  ;;  %1339 = vmatprep.mubr.bf16.mxu1 %v1865_v16  ;;  %v1501_v17 = vld [vmem:[#allocation8] sm:$0xff]   ;;  %v1502_v18 = vld [vmem:[#allocation8 + $0x8] sm:$0xff]   ;;  %v1503_v19 = vld [vmem:[#allocation8 + $0x10] sm:$0xff]  }
  0x60   :  { %1295 = vmatprep.subr.bf16.mxu0 %v1479_v2  ;;  %v1504_v20 = vld [vmem:[#allocation8 + $0x18] sm:$0xff]   ;;  %v1505_v21 = vld [vmem:[#allocation8 + $0x20] sm:$0xff]   ;;  %v1506_v22 = vld [vmem:[#allocation8 + $0x28] sm:$0xff]  }
  0x61   :  { %v1868_v47 = vld [vmem:[#allocation2 + $0x8] sm:$0xff]   ;;  %v1870_v48 = vld [vmem:[#allocation2 + $0x10] sm:$0xff]   ;;  %v1874_v49 = vld [vmem:[#allocation2 + $0x18] sm:$0xff]  }
  0x62   :  { %v1876_v50 = vld [vmem:[#allocation2 + $0x20] sm:$0xff]   ;;  %v1880_v51 = vld [vmem:[#allocation2 + $0x28] sm:$0xff]   ;;  %v1882_v52 = vld [vmem:[#allocation2 + $0x30] sm:$0xff]  }
  0x63   :  { %1296 = vmatpush3.bf16.msra.mxu0 %v1479_v2  ;;  %v1886_v53 = vld [vmem:[#allocation2 + $0x38] sm:$0xff]   ;;  %v1507_v54 = vld [vmem:[#allocation8 + $0x30] sm:$0xff]   ;;  %v1184_v56 = vld [vmem:[%s2005_s3] ss:$0 sm:$0xff] }
  0x64   :  { %1297 = vmatprep.subr.bf16.mxu0 %v1480_v3  ;;  %v1508_v55 = vld [vmem:[#allocation8 + $0x38] sm:$0xff]  }
  0x67   :  { %1298 = vmatpush3.bf16.msra.mxu0 %v1480_v3 }
  0x68   :  { %1299 = vmatprep.subr.bf16.mxu0 %v1481_v5 }
  0x6b   :  { %1300 = vmatpush3.bf16.msra.mxu0 %v1481_v5 }
  0x6c   :  { %1301 = vmatprep.subr.bf16.mxu0 %v1482_v6 }
  0x6f   :  { %1302 = vmatpush3.bf16.msra.mxu0 %v1482_v6 }
  0x70   :  { %1303 = vmatprep.subr.bf16.mxu0 %v1483_v7 }
  0x73   :  { %1304 = vmatpush3.bf16.msra.mxu0 %v1483_v7 }
  0x74   :  { %1305 = vmatprep.subr.bf16.mxu0 %v1484_v8 }
  0x77   :  { %1306 = vmatpush3.bf16.msra.mxu0 %v1484_v8 }
  0x78   :  { %1355 = vmatprep.subr.bf16.mxu0 %v1501_v17 }
  0x7a   :  { %1308 = vmatmul.mubr.bf16.vlgmr.msra.gmra.mrb[0].mxu0 %v1486_v9 }
  0x7b   :  { %1311 = vmatprep.mubr.bf16.mxu0 %v1487_v10  ;;  %1356 = vmatpush3.bf16.msra.mxu0 %v1501_v17 }
  0x7c   :  { %1357 = vmatprep.subr.bf16.mxu0 %v1502_v18 }
  0x7f   :  { %1358 = vmatpush3.bf16.msra.mxu0 %v1502_v18 }
  0x80   :  { %1359 = vmatprep.subr.bf16.mxu0 %v1503_v19 }
  0x82   :  { %1312 = vmatmul.mubr.bf16.gmra.mrb[4].mxu0 %v1488_v11 }
  0x83   :  { %1315 = vmatprep.mubr.bf16.mxu0 %v1489_v12  ;;  %1360 = vmatpush3.bf16.msra.mxu0 %v1503_v19 }
  0x84   :  { %1361 = vmatprep.subr.bf16.mxu0 %v1504_v20 }
  0x87   :  { %1362 = vmatpush3.bf16.msra.mxu0 %v1504_v20 }
  0x88   :  { %1363 = vmatprep.subr.bf16.mxu0 %v1505_v21 }
  0x8a   :  { %1316 = vmatmul.mubr.bf16.gmra.mrb[8].mxu0 %v1490_v13 }
  0x8b   :  { %1319 = vmatprep.mubr.bf16.mxu0 %v1491_v14  ;;  %1364 = vmatpush3.bf16.msra.mxu0 %v1505_v21 }
  0x8c   :  { %1365 = vmatprep.subr.bf16.mxu0 %v1506_v22 }
  0x8f   :  { %1366 = vmatpush3.bf16.msra.mxu0 %v1506_v22 }
  0x90   :  { %1367 = vmatprep.subr.bf16.mxu0 %v1507_v54 }
  0x92   :  { %1320 = vmatmul.mubr.bf16.gmra.mrb[12].mxu0 %v1492_v15 }
  0x93   :  { %1368 = vmatpush3.bf16.msra.mxu0 %v1507_v54 }
  0x94   :  { %1369 = vmatprep.subr.bf16.mxu0 %v1508_v55 }
  0x97   :  { %1370 = vmatpush3.bf16.msra.mxu0 %v1508_v55 }
 0x14d   :  { %v1309_v23 = vpop.f32.mrb[0].mxu0 }
 0x14e   :  { %v277_v24 = vpop.f32.mrb[1].mxu0 }
 0x14f   :  { %v1310_v25 = vpop.f32.mrb[2].mxu0 }
 0x150   :  { %v341_v26 = vpack.c.bf16 %v1310_v25, %v1309_v23  ;;  %v280_v27 = vpop.f32.mrb[3].mxu0 }
 0x151   :  { %v340_v28 = vpack.c.bf16 %v280_v27, %v277_v24 }
 0x153   :  { %1323 = vmatprep.subr.bf16.mxu1 %v340_v28 }
 0x154   :  { %1324 = vmatpush3.bf16.msra.mxu1 %v340_v28 }
 0x155   :  { %v1313_v29 = vpop.f32.mrb[4].mxu0  ;;  %1325 = vmatprep.subr.bf16.mxu1 %v341_v26 }
 0x156   :  { %v293_v30 = vpop.f32.mrb[5].mxu0 }
 0x157   :  { %v1314_v31 = vpop.f32.mrb[6].mxu0 }
 0x158   :  { %v343_v32 = vpack.c.bf16 %v1314_v31, %v1313_v29  ;;  %v296_v33 = vpop.f32.mrb[7].mxu0  ;;  %1326 = vmatpush3.bf16.msra.mxu1 %v341_v26 }
 0x159   :  { %v342_v34 = vpack.c.bf16 %v296_v33, %v293_v30 }
 0x15b   :  { %1327 = vmatprep.subr.bf16.mxu1 %v342_v34 }
 0x15c   :  { %1328 = vmatpush3.bf16.msra.mxu1 %v342_v34 }
 0x15d   :  { %v1317_v35 = vpop.f32.mrb[8].mxu0  ;;  %1329 = vmatprep.subr.bf16.mxu1 %v343_v32 }
 0x15e   :  { %v309_v36 = vpop.f32.mrb[9].mxu0 }
 0x15f   :  { %v1318_v37 = vpop.f32.mrb[10].mxu0 }
 0x160   :  { %v345_v38 = vpack.c.bf16 %v1318_v37, %v1317_v35  ;;  %v312_v39 = vpop.f32.mrb[11].mxu0  ;;  %1330 = vmatpush3.bf16.msra.mxu1 %v343_v32 }
 0x161   :  { %v344_v40 = vpack.c.bf16 %v312_v39, %v309_v36 }
 0x163   :  { %1331 = vmatprep.subr.bf16.mxu1 %v344_v40 }
 0x164   :  { %1332 = vmatpush3.bf16.msra.mxu1 %v344_v40 }
 0x165   :  { %v1321_v41 = vpop.f32.mrb[12].mxu0  ;;  %1333 = vmatprep.subr.bf16.mxu1 %v345_v38 }
 0x166   :  { %v325_v42 = vpop.f32.mrb[13].mxu0 }
 0x167   :  { %v1322_v43 = vpop.f32.mrb[14].mxu0 }
 0x168   :  { %v347_v44 = vpack.c.bf16 %v1322_v43, %v1321_v41  ;;  %v328_v45 = vpop.f32.mrb[15].mxu0  ;;  %1334 = vmatpush3.bf16.msra.mxu1 %v345_v38 }
 0x169   :  { %v346_v46 = vpack.c.bf16 %v328_v45, %v325_v42 }
 0x16b   :  { %1335 = vmatprep.subr.bf16.mxu1 %v346_v46 }
 0x16c   :  { %1336 = vmatpush3.bf16.msra.mxu1 %v346_v46 }
 0x16d   :  { %1337 = vmatprep.subr.bf16.mxu1 %v347_v44 }
 0x170   :  { %1338 = vmatpush3.bf16.msra.mxu1 %v347_v44 }
 0x173   :  { %1340 = vmatmul.mubr.bf16.vlgmr.msra.gmra.mrb[0].mxu1 %v1868_v47 }
 0x174   :  { %1343 = vmatprep.mubr.bf16.mxu1 %v1870_v48 }
 0x17b   :  { %1344 = vmatmul.mubr.bf16.gmra.mrb[4].mxu1 %v1874_v49 }
 0x17c   :  { %1347 = vmatprep.mubr.bf16.mxu1 %v1876_v50 }
 0x183   :  { %1348 = vmatmul.mubr.bf16.gmra.mrb[8].mxu1 %v1880_v51 }
 0x184   :  { %1351 = vmatprep.mubr.bf16.mxu1 %v1882_v52 }
 0x18b   :  { %1352 = vmatmul.mubr.bf16.gmra.mrb[12].mxu1 %v1886_v53 }
 0x18c   :  { %1403 = vmatprep.mubr.bf16.mxu1 %v1865_v16 }
 0x246   :  { %v1341_v57 = vpop.f32.mrb[0].mxu1 }
 0x247   :  { %v446_v58 = vadd.f32 %v1341_v57, %v1184_v56  ;;  %v437_v59 = vpop.f32.mrb[1].mxu1  ;;  %v1509_v57 = vld [vmem:[#allocation10] sm:$0xff]  }
 0x248   :  { %v438_v60 = vadd.f32 %v1184_v56, %v437_v59  ;;  %v1342_v61 = vpop.f32.mrb[2].mxu1  ;;  %1419 = vmatprep.subr.bf16.mxu0 %v1509_v57  ;;  %v1511_v59 = vld [vmem:[#allocation10 + $0x10] sm:$0xff]  }
 0x249   :  { %v449_v62 = vadd.f32 %v1342_v61, %v1184_v56  ;;  %v440_v63 = vpop.f32.mrb[3].mxu1  ;;  %v502_v1 = vmax.f32 %v446_v58, 0.0  ;;  %v1510_v58 = vld [vmem:[#allocation10 + $0x8] sm:$0xff]  }
 0x24a   :  { %v441_v0 = vadd.f32 %v1184_v56, %v440_v63  ;;  %v500_v3 = vmax.f32 %v438_v60, 0.0  ;;  %v1512_v60 = vld [vmem:[#allocation10 + $0x18] sm:$0xff]   ;;  %v1514_v61 = vld [vmem:[#allocation10 + $0x28] sm:$0xff]  }
 0x24b   :  { %v503_v2 = vmax.f32 %v449_v62, 0.0 }
 0x24c   :  { %v501_v4 = vmax.f32 %v441_v0, 0.0 }
 0x24d   :  { %v517_v5 = vpack.c.bf16 %v503_v2, %v502_v1 }
 0x24e   :  { %v516_v6 = vpack.c.bf16 %v501_v4, %v500_v3  ;;  %v1345_v7 = vpop.f32.mrb[4].mxu1 }
 0x24f   :  { %v462_v8 = vadd.f32 %v1345_v7, %v1184_v56  ;;  %v453_v9 = vpop.f32.mrb[5].mxu1 }
 0x250   :  { %v454_v10 = vadd.f32 %v1184_v56, %v453_v9  ;;  %v1346_v11 = vpop.f32.mrb[6].mxu1  ;;  %1371 = vmatprep.mubr.bf16.mxu0 %v516_v6 }
 0x251   :  { %v465_v12 = vadd.f32 %v1346_v11, %v1184_v56  ;;  %v456_v13 = vpop.f32.mrb[7].mxu1  ;;  %1372 = vmatmul.mubr.bf16.vlgmr.msra.gmra.mrb[16].mxu0 %v517_v5  ;;  %v506_v15 = vmax.f32 %v462_v8, 0.0 }
 0x252   :  { %v457_v14 = vadd.f32 %v1184_v56, %v456_v13  ;;  %v504_v17 = vmax.f32 %v454_v10, 0.0  ;;  %1420 = vmatpush3.bf16.msra.mxu0 %v1509_v57 }
 0x253   :  { %v507_v16 = vmax.f32 %v465_v12, 0.0  ;;  %1421 = vmatprep.subr.bf16.mxu0 %v1510_v58 }
 0x254   :  { %v505_v18 = vmax.f32 %v457_v14, 0.0 }
 0x255   :  { %v519_v19 = vpack.c.bf16 %v507_v16, %v506_v15 }
 0x256   :  { %v518_v20 = vpack.c.bf16 %v505_v18, %v504_v17  ;;  %v1349_v21 = vpop.f32.mrb[8].mxu1  ;;  %1422 = vmatpush3.bf16.msra.mxu0 %v1510_v58 }
 0x257   :  { %v478_v22 = vadd.f32 %v1349_v21, %v1184_v56  ;;  %v469_v23 = vpop.f32.mrb[9].mxu1  ;;  %1423 = vmatprep.subr.bf16.mxu0 %v1511_v59 }
 0x258   :  { %v470_v24 = vadd.f32 %v1184_v56, %v469_v23  ;;  %v1350_v25 = vpop.f32.mrb[10].mxu1  ;;  %1375 = vmatprep.mubr.bf16.mxu0 %v518_v20 }
 0x259   :  { %v481_v26 = vadd.f32 %v1350_v25, %v1184_v56  ;;  %v472_v27 = vpop.f32.mrb[11].mxu1  ;;  %1376 = vmatmul.mubr.bf16.gmra.mrb[20].mxu0 %v519_v19  ;;  %v510_v29 = vmax.f32 %v478_v22, 0.0 }
 0x25a   :  { %v473_v28 = vadd.f32 %v1184_v56, %v472_v27  ;;  %v508_v31 = vmax.f32 %v470_v24, 0.0  ;;  %1424 = vmatpush3.bf16.msra.mxu0 %v1511_v59 }
 0x25b   :  { %v511_v30 = vmax.f32 %v481_v26, 0.0  ;;  %1425 = vmatprep.subr.bf16.mxu0 %v1512_v60 }
 0x25c   :  { %v509_v32 = vmax.f32 %v473_v28, 0.0 }
 0x25d   :  { %v521_v33 = vpack.c.bf16 %v511_v30, %v510_v29 }
 0x25e   :  { %v520_v34 = vpack.c.bf16 %v509_v32, %v508_v31  ;;  %v1353_v35 = vpop.f32.mrb[12].mxu1  ;;  %1426 = vmatpush3.bf16.msra.mxu0 %v1512_v60 }
 0x25f   :  { %v494_v36 = vadd.f32 %v1353_v35, %v1184_v56  ;;  %v485_v37 = vpop.f32.mrb[13].mxu1 }
 0x260   :  { %v486_v38 = vadd.f32 %v1184_v56, %v485_v37  ;;  %v1354_v39 = vpop.f32.mrb[14].mxu1  ;;  %1379 = vmatprep.mubr.bf16.mxu0 %v520_v34 }
 0x261   :  { %v497_v40 = vadd.f32 %v1354_v39, %v1184_v56  ;;  %v488_v41 = vpop.f32.mrb[15].mxu1  ;;  %1380 = vmatmul.mubr.bf16.gmra.mrb[24].mxu0 %v521_v33  ;;  %v514_v43 = vmax.f32 %v494_v36, 0.0 }
 0x262   :  { %v489_v42 = vadd.f32 %v1184_v56, %v488_v41  ;;  %v512_v45 = vmax.f32 %v486_v38, 0.0  ;;  %v1513_v56 = vld [vmem:[#allocation10 + $0x20] sm:$0xff]  }
 0x263   :  { %v515_v44 = vmax.f32 %v497_v40, 0.0  ;;  %1427 = vmatprep.subr.bf16.mxu0 %v1513_v56 }
 0x264   :  { %v513_v46 = vmax.f32 %v489_v42, 0.0  ;;  %1428 = vmatpush3.bf16.msra.mxu0 %v1513_v56 }
 0x265   :  { %v523_v54 = vpack.c.bf16 %v515_v44, %v514_v43  ;;  %1429 = vmatprep.subr.bf16.mxu0 %v1514_v61 }
 0x266   :  { %v522_v55 = vpack.c.bf16 %v513_v46, %v512_v45 }
 0x268   :  { %1383 = vmatprep.mubr.bf16.mxu0 %v522_v55  ;;  %1430 = vmatpush3.bf16.msra.mxu0 %v1514_v61 }
 0x269   :  { %1384 = vmatmul.mubr.bf16.gmra.mrb[28].mxu0 %v523_v54 }
 0x324   :  { %v1373_v62 = vpop.f32.mrb[16].mxu0 }
 0x325   :  { %v622_v63 = vpop.f32.mrb[17].mxu0 }
 0x326   :  { %v1374_v0 = vpop.f32.mrb[18].mxu0 }
 0x327   :  { %v686_v1 = vpack.c.bf16 %v1374_v0, %v1373_v62  ;;  %v625_v2 = vpop.f32.mrb[19].mxu0 }
 0x328   :  { %v685_v3 = vpack.c.bf16 %v625_v2, %v622_v63 }
 0x32a   :  { %1387 = vmatprep.subr.bf16.mxu1 %v685_v3 }
 0x32b   :  { %1388 = vmatpush3.bf16.msra.mxu1 %v685_v3 }
 0x32c   :  { %v1377_v4 = vpop.f32.mrb[20].mxu0  ;;  %1389 = vmatprep.subr.bf16.mxu1 %v686_v1 }
 0x32d   :  { %v638_v5 = vpop.f32.mrb[21].mxu0 }
 0x32e   :  { %v1378_v6 = vpop.f32.mrb[22].mxu0 }
 0x32f   :  { %v688_v7 = vpack.c.bf16 %v1378_v6, %v1377_v4  ;;  %v641_v8 = vpop.f32.mrb[23].mxu0  ;;  %1390 = vmatpush3.bf16.msra.mxu1 %v686_v1  ;;  %v1202_v1 = vld [vmem:[%s2009_s7] ss:$0 sm:$0xff]  ;;  %s1728_s7 = smov [#allocation11]  }
 0x330   :  { %v687_v9 = vpack.c.bf16 %v641_v8, %v638_v5  ;;  %s1154_s22 = sshll.u32 %s1728_s7, 4  ;;  %s1155_s22 = int_to_ptr.vmem [resolvable:$true] %s1154_s22 }
 0x331   :  { %s1691_s23 = scalar_lea.vmem %s1155_s22, 2048  ;;  %p1696_p13 = scmp.lt.s32.totalorder %s1155_s22, %s1155_s22 }
 0x332   :  { %1391 = vmatprep.subr.bf16.mxu1 %v687_v9  ;;  %p1692_p12 = scmp.ne.s32.totalorder %s1155_s22, %s1691_s23  ;;  %p1697_p0 = scmp.lt.s32.totalorder %s1691_s23, %s1691_s23 }
 0x333   :  { %1392 = vmatpush3.bf16.msra.mxu1 %v687_v9 }
 0x334   :  { %v1381_v10 = vpop.f32.mrb[24].mxu0  ;;  %1393 = vmatprep.subr.bf16.mxu1 %v688_v7  ;;  %p1698_p1 = por %p1697_p0, %p1696_p13 }
 0x335   :  { %v654_v11 = vpop.f32.mrb[25].mxu0 }
 0x336   :  { %v1382_v12 = vpop.f32.mrb[26].mxu0  ;;  %p1699_p2 = pnand %p1698_p1, %p1692_p12 }
 0x337   :  { %v690_v13 = vpack.c.bf16 %v1382_v12, %v1381_v10  ;;  %v657_v14 = vpop.f32.mrb[27].mxu0  ;;  %1394 = vmatpush3.bf16.msra.mxu1 %v688_v7 }
 0x338   :  { %v689_v15 = vpack.c.bf16 %v657_v14, %v654_v11 }
 0x33a   :  { %1395 = vmatprep.subr.bf16.mxu1 %v689_v15 }
 0x33b   :  { %1396 = vmatpush3.bf16.msra.mxu1 %v689_v15 }
 0x33c   :  { %v1385_v16 = vpop.f32.mrb[28].mxu0  ;;  %1397 = vmatprep.subr.bf16.mxu1 %v690_v13 }
 0x33d   :  { %v670_v17 = vpop.f32.mrb[29].mxu0 }
 0x33e   :  { %v1386_v18 = vpop.f32.mrb[30].mxu0 }
 0x33f   :  { %v692_v19 = vpack.c.bf16 %v1386_v18, %v1385_v16  ;;  %v673_v20 = vpop.f32.mrb[31].mxu0  ;;  %1398 = vmatpush3.bf16.msra.mxu1 %v690_v13 }
 0x340   :  { %v691_v21 = vpack.c.bf16 %v673_v20, %v670_v17 }
 0x342   :  { %1399 = vmatprep.subr.bf16.mxu1 %v691_v21 }
 0x343   :  { %1400 = vmatpush3.bf16.msra.mxu1 %v691_v21 }
 0x344   :  { %1401 = vmatprep.subr.bf16.mxu1 %v692_v19 }
 0x347   :  { %1402 = vmatpush3.bf16.msra.mxu1 %v692_v19 }
 0x348   :  { %1451 = vmatprep.subr.bf16.mxu1 %v1509_v57 }
 0x34a   :  { %1404 = vmatmul.mubr.bf16.vlgmr.msra.gmra.mrb[16].mxu1 %v1868_v47  ;;  %v1515_v47 = vld [vmem:[#allocation10 + $0x30] sm:$0xff]  }
 0x34b   :  { %1407 = vmatprep.mubr.bf16.mxu1 %v1870_v48  ;;  %1459 = vmatpush3.bf16.msra.mxu1 %v1509_v57  ;;  %v1516_v48 = vld [vmem:[#allocation10 + $0x38] sm:$0xff]  }
 0x34c   :  { %1452 = vmatprep.subr.bf16.mxu1 %v1510_v58  ;;  %1431 = vmatprep.subr.bf16.mxu0 %v1515_v47 }
 0x34d   :  { %1432 = vmatpush3.bf16.msra.mxu0 %v1515_v47 }
 0x34e   :  { %1433 = vmatprep.subr.bf16.mxu0 %v1516_v48 }
 0x34f   :  { %1460 = vmatpush3.bf16.msra.mxu1 %v1510_v58 }
 0x350   :  { %1453 = vmatprep.subr.bf16.mxu1 %v1511_v59 }
 0x351   :  { %1434 = vmatpush3.bf16.msra.mxu0 %v1516_v48 }
 0x352   :  { %1408 = vmatmul.mubr.bf16.gmra.mrb[20].mxu1 %v1874_v49 }
 0x353   :  { %1411 = vmatprep.mubr.bf16.mxu1 %v1876_v50  ;;  %1461 = vmatpush3.bf16.msra.mxu1 %v1511_v59  ;;  %v1201_v50 = vld [vmem:[%s2007_s5] ss:$0 sm:$0xff] }
 0x354   :  { %1454 = vmatprep.subr.bf16.mxu1 %v1512_v60 }
 0x357   :  { %1462 = vmatpush3.bf16.msra.mxu1 %v1512_v60 }
 0x358   :  { %1455 = vmatprep.subr.bf16.mxu1 %v1513_v56 }
 0x35a   :  { %1412 = vmatmul.mubr.bf16.gmra.mrb[24].mxu1 %v1880_v51 }
 0x35b   :  { %1415 = vmatprep.mubr.bf16.mxu1 %v1882_v52  ;;  %1463 = vmatpush3.bf16.msra.mxu1 %v1513_v56 }
 0x35c   :  { %1456 = vmatprep.subr.bf16.mxu1 %v1514_v61 }
 0x35f   :  { %1464 = vmatpush3.bf16.msra.mxu1 %v1514_v61 }
 0x360   :  { %1457 = vmatprep.subr.bf16.mxu1 %v1515_v47 }
 0x362   :  { %1416 = vmatmul.mubr.bf16.gmra.mrb[28].mxu1 %v1886_v53 }
 0x363   :  { %1465 = vmatpush3.bf16.msra.mxu1 %v1515_v47 }
 0x364   :  { %1458 = vmatprep.subr.bf16.mxu1 %v1516_v48 }
 0x367   :  { %1466 = vmatpush3.bf16.msra.mxu1 %v1516_v48 }
 0x41d   :  { %v1405_v49 = vpop.f32.mrb[16].mxu1 }
 0x41e   :  { %v734_v51 = vpop.f32.mrb[17].mxu1  ;;  %v743_v22 = vadd.f32 %v1405_v49, %v1201_v50 }
 0x41f   :  { %v1406_v52 = vpop.f32.mrb[18].mxu1  ;;  %v735_v24 = vadd.f32 %v1201_v50, %v734_v51 }
 0x420   :  { %v746_v23 = vadd.f32 %v1406_v52, %v1201_v50  ;;  %v737_v53 = vpop.f32.mrb[19].mxu1 }
 0x421   :  { %v738_v25 = vadd.f32 %v1201_v50, %v737_v53 }
 0x422   :  { %v798_v26 = vpack.c.bf16 %v746_v23, %v743_v22 }
 0x423   :  { %v797_v27 = vpack.c.bf16 %v738_v25, %v735_v24 }
 0x425   :  { %v1409_v28 = vpop.f32.mrb[20].mxu1  ;;  %1435 = vmatprep.mubr.bf16.mxu0 %v797_v27 }
 0x426   :  { %v759_v29 = vadd.f32 %v1409_v28, %v1201_v50  ;;  %v750_v30 = vpop.f32.mrb[21].mxu1  ;;  %1436 = vmatmul.mubr.bf16.vlgmr.msra.gmra.mrb[32].mxu0 %v798_v26 }
 0x427   :  { %v1410_v31 = vpop.f32.mrb[22].mxu1  ;;  %v751_v34 = vadd.f32 %v1201_v50, %v750_v30 }
 0x428   :  { %v762_v32 = vadd.f32 %v1410_v31, %v1201_v50  ;;  %v753_v33 = vpop.f32.mrb[23].mxu1 }
 0x429   :  { %v754_v35 = vadd.f32 %v1201_v50, %v753_v33 }
 0x42a   :  { %v800_v36 = vpack.c.bf16 %v762_v32, %v759_v29 }
 0x42b   :  { %v799_v37 = vpack.c.bf16 %v754_v35, %v751_v34 }
 0x42d   :  { %v1413_v38 = vpop.f32.mrb[24].mxu1  ;;  %1439 = vmatprep.mubr.bf16.mxu0 %v799_v37 }
 0x42e   :  { %v775_v39 = vadd.f32 %v1413_v38, %v1201_v50  ;;  %v766_v40 = vpop.f32.mrb[25].mxu1  ;;  %1440 = vmatmul.mubr.bf16.gmra.mrb[36].mxu0 %v800_v36 }
 0x42f   :  { %v1414_v41 = vpop.f32.mrb[26].mxu1  ;;  %v767_v44 = vadd.f32 %v1201_v50, %v766_v40 }
 0x430   :  { %v778_v42 = vadd.f32 %v1414_v41, %v1201_v50  ;;  %v769_v43 = vpop.f32.mrb[27].mxu1 }
 0x431   :  { %v770_v45 = vadd.f32 %v1201_v50, %v769_v43 }
 0x432   :  { %v802_v46 = vpack.c.bf16 %v778_v42, %v775_v39 }
 0x433   :  { %v801_v54 = vpack.c.bf16 %v770_v45, %v767_v44 }
 0x435   :  { %v1417_v55 = vpop.f32.mrb[28].mxu1  ;;  %1443 = vmatprep.mubr.bf16.mxu1 %v801_v54 }
 0x436   :  { %v791_v57 = vadd.f32 %v1417_v55, %v1201_v50  ;;  %v782_v58 = vpop.f32.mrb[29].mxu1  ;;  %1444 = vmatmul.mubr.bf16.vlgmr.msra.gmra.mrb[32].mxu1 %v802_v46 }
 0x437   :  { %v1418_v59 = vpop.f32.mrb[30].mxu1  ;;  %v783_v61 = vadd.f32 %v1201_v50, %v782_v58 }
 0x438   :  { %v794_v60 = vadd.f32 %v1418_v59, %v1201_v50  ;;  %v785_v56 = vpop.f32.mrb[31].mxu1 }
 0x439   :  { %v786_v62 = vadd.f32 %v1201_v50, %v785_v56 }
 0x43a   :  { %v804_v63 = vpack.c.bf16 %v794_v60, %v791_v57 }
 0x43b   :  { %v803_v0 = vpack.c.bf16 %v786_v62, %v783_v61 }
 0x43d   :  { %1447 = vmatprep.mubr.bf16.mxu1 %v803_v0 }
 0x43e   :  { %1448 = vmatmul.mubr.bf16.gmra.mrb[36].mxu1 %v804_v63 }
 0x4f9   :  { %v1437_v2 = vpop.f32.mrb[32].mxu0 }
 0x4fa   :  { %v919_v3 = vadd.f32 %v1437_v2, %v1202_v1  ;;  %v910_v4 = vpop.f32.mrb[33].mxu0 }
 0x4fb   :  { %v911_v5 = vadd.f32 %v1202_v1, %v910_v4  ;;  %v1438_v6 = vpop.f32.mrb[34].mxu0 }
 0x4fc   :  { %977 = vmax.xlane.f32.xlu1 %v919_v3  ;;  %v913_v7 = vpop.f32.mrb[35].mxu0  ;;  %v922_v8 = vadd.f32 %v1438_v6, %v1202_v1 }
 0x4fd   :  { %973 = vmax.xlane.f32.xlu0 %v911_v5  ;;  %v914_v9 = vadd.f32 %v1202_v1, %v913_v7 }
 0x500   :  { %979 = vmax.xlane.f32.xlu1 %v922_v8 }
 0x501   :  { %v1441_v10 = vpop.f32.mrb[36].mxu0  ;;  %975 = vmax.xlane.f32.xlu0 %v914_v9 }
 0x502   :  { %v935_v11 = vadd.f32 %v1441_v10, %v1202_v1  ;;  %v926_v12 = vpop.f32.mrb[37].mxu0 }
 0x503   :  { %v1442_v13 = vpop.f32.mrb[38].mxu0  ;;  %v927_v16 = vadd.f32 %v1202_v1, %v926_v12 }
 0x504   :  { %v938_v14 = vadd.f32 %v1442_v13, %v1202_v1  ;;  %v929_v15 = vpop.f32.mrb[39].mxu0 }
 0x505   :  { %985 = vmax.xlane.f32.xlu0 %v935_v11  ;;  %v930_v17 = vadd.f32 %v1202_v1, %v929_v15 }
 0x506   :  { %987 = vmax.xlane.f32.xlu1 %v938_v14 }
 0x509   :  { %v1445_v18 = vpop.f32.mrb[32].mxu1  ;;  %981 = vmax.xlane.f32.xlu0 %v927_v16 }
 0x50a   :  { %v951_v19 = vadd.f32 %v1445_v18, %v1202_v1  ;;  %v942_v20 = vpop.f32.mrb[33].mxu1  ;;  %983 = vmax.xlane.f32.xlu1 %v930_v17 }
 0x50b   :  { %v1446_v21 = vpop.f32.mrb[34].mxu1  ;;  %v943_v49 = vadd.f32 %v1202_v1, %v942_v20 }
 0x50c   :  { %v954_v47 = vadd.f32 %v1446_v21, %v1202_v1  ;;  %v945_v48 = vpop.f32.mrb[35].mxu1 }
 0x50d   :  { %993 = vmax.xlane.f32.xlu0 %v951_v19  ;;  %v1906_v50 = vadd.f32 %v1202_v1, %v945_v48 }
 0x50e   :  { %995 = vmax.xlane.f32.xlu1 %v954_v47 }
 0x511   :  { %v1449_v51 = vpop.f32.mrb[36].mxu1  ;;  %989 = vmax.xlane.f32.xlu0 %v943_v49 }
 0x512   :  { %v958_v52 = vpop.f32.mrb[37].mxu1  ;;  %991 = vmax.xlane.f32.xlu1 %v1906_v50  ;;  %v1914_v25 = vadd.f32 %v1449_v51, %v1202_v1 }
 0x513   :  { %v1909_v22 = vadd.f32 %v1202_v1, %v958_v52  ;;  %v1450_v23 = vpop.f32.mrb[38].mxu1 }
 0x514   :  { %v961_v53 = vpop.f32.mrb[39].mxu1  ;;  %v1917_v26 = vadd.f32 %v1450_v23, %v1202_v1 }
 0x515   :  { %v1911_v24 = vadd.f32 %v1202_v1, %v961_v53  ;;  %997 = vmax.xlane.f32.xlu0 %v1909_v22 }
 0x517   :  { %999 = vmax.xlane.f32.xlu1 %v1911_v24 }
 0x519   :  { %1001 = vmax.xlane.f32.xlu0 %v1914_v25 }
 0x51b   :  { %1003 = vmax.xlane.f32.xlu1 %v1917_v26 }
 0x589   :  { %v978_v27 = vpop.xlane.xlu1 %977 }
 0x58a   :  { %v1921_v28 = vsub.f32 %v919_v3, %v978_v27  ;;  %v974_v29 = vpop.xlane.xlu0 %973 }
 0x58b   :  { %v1923_v30 = vsub.f32 %v911_v5, %v974_v29 }
 0x58c   :  { %v1025_v31 = vmul.f32 1.442695, %v1921_v28 }
 0x58d   :  { %v1021_v32 = vmul.f32 1.442695, %v1923_v30  ;;  %v980_v33 = vpop.xlane.xlu1 %979 }
 0x58e   :  { %1517 = vpow2.f32 %v1025_v31  ;;  %v1927_v34 = vsub.f32 %v922_v8, %v980_v33  ;;  %v976_v35 = vpop.xlane.xlu0 %975 }
 0x58f   :  { %v1929_v36 = vsub.f32 %v914_v9, %v976_v35  ;;  %1519 = vpow2.f32 %v1021_v32 }
 0x590   :  { %v1027_v37 = vmul.f32 1.442695, %v1927_v34 }
 0x591   :  { %v1023_v38 = vmul.f32 1.442695, %v1929_v36 }
 0x592   :  { %1521 = vpow2.f32 %v1027_v37  ;;  %v986_v39 = vpop.xlane.xlu0 %985 }
 0x593   :  { %v1933_v40 = vsub.f32 %v935_v11, %v986_v39  ;;  %v988_v41 = vpop.xlane.xlu1 %987  ;;  %1523 = vpow2.f32 %v1023_v38 }
 0x594   :  { %v1935_v42 = vsub.f32 %v938_v14, %v988_v41 }
 0x595   :  { %v1033_v43 = vmul.f32 1.442695, %v1933_v40 }
 0x596   :  { %v1035_v44 = vmul.f32 1.442695, %v1935_v42  ;;  %v982_v45 = vpop.xlane.xlu0 %981 }
 0x597   :  { %1525 = vpow2.f32 %v1033_v43  ;;  %v1939_v46 = vsub.f32 %v927_v16, %v982_v45  ;;  %v984_v54 = vpop.xlane.xlu1 %983 }
 0x598   :  { %v1518_v55 = vpop.eup %1517  ;;  %v1941_v57 = vsub.f32 %v930_v17, %v984_v54  ;;  %1527 = vpow2.f32 %v1035_v44 }
 0x599   :  { %v1029_v58 = vmul.f32 1.442695, %v1939_v46  ;;  %1057 = vadd.xlane.f32.xlu0 %v1518_v55  ;;  %v1520_v56 = vpop.eup %1519 }
 0x59a   :  { %v1031_v59 = vmul.f32 1.442695, %v1941_v57  ;;  %v994_v60 = vpop.xlane.xlu0 %993 }
 0x59b   :  { %1529 = vpow2.f32 %v1029_v58  ;;  %v1945_v61 = vsub.f32 %v951_v19, %v994_v60  ;;  %v996_v62 = vpop.xlane.xlu1 %995 }
 0x59c   :  { %v1522_v63 = vpop.eup %1521  ;;  %v1947_v0 = vsub.f32 %v954_v47, %v996_v62  ;;  %1531 = vpow2.f32 %v1031_v59 }
 0x59d   :  { %v1041_v1 = vmul.f32 1.442695, %v1945_v61  ;;  %1059 = vadd.xlane.f32.xlu1 %v1522_v63  ;;  %1053 = vadd.xlane.f32.xlu0 %v1520_v56  ;;  %v1524_v6 = vpop.eup %1523 }
 0x59e   :  { %v1043_v2 = vmul.f32 1.442695, %v1947_v0  ;;  %v990_v3 = vpop.xlane.xlu0 %989 }
 0x59f   :  { %1533 = vpow2.f32 %v1041_v1  ;;  %v1951_v4 = vsub.f32 %v943_v49, %v990_v3  ;;  %v992_v5 = vpop.xlane.xlu1 %991 }
 0x5a0   :  { %v1954_v7 = vsub.f32 %v1906_v50, %v992_v5  ;;  %1535 = vpow2.f32 %v1043_v2 }
 0x5a1   :  { %v1526_v8 = vpop.eup %1525  ;;  %v1037_v9 = vmul.f32 1.442695, %v1951_v4  ;;  %1055 = vadd.xlane.f32.xlu1 %v1524_v6 }
 0x5a2   :  { %v1039_v10 = vmul.f32 1.442695, %v1954_v7  ;;  %1065 = vadd.xlane.f32.xlu0 %v1526_v8  ;;  %v998_v11 = vpop.xlane.xlu0 %997  ;;  %v1528_v13 = vpop.eup %1527 }
 0x5a3   :  { %1537 = vpow2.f32 %v1037_v9  ;;  %v1959_v12 = vsub.f32 %v1909_v22, %v998_v11 }
 0x5a4   :  { %v1000_v14 = vpop.xlane.xlu1 %999  ;;  %1539 = vpow2.f32 %v1039_v10 }
 0x5a5   :  { %v1530_v15 = vpop.eup %1529  ;;  %v1045_v16 = vmul.f32 1.442695, %v1959_v12  ;;  %v1963_v17 = vsub.f32 %v1911_v24, %v1000_v14  ;;  %1067 = vadd.xlane.f32.xlu1 %v1528_v13 }
 0x5a6   :  { %1061 = vadd.xlane.f32.xlu0 %v1530_v15  ;;  %v1002_v18 = vpop.xlane.xlu0 %1001  ;;  %v1532_v21 = vpop.eup %1531 }
 0x5a7   :  { %1541 = vpow2.f32 %v1045_v16  ;;  %v1047_v19 = vmul.f32 1.442695, %v1963_v17  ;;  %v1967_v20 = vsub.f32 %v1914_v25, %v1002_v18 }
 0x5a8   :  { %v1004_v47 = vpop.xlane.xlu1 %1003 }
 0x5a9   :  { %v1534_v48 = vpop.eup %1533  ;;  %1543 = vpow2.f32 %v1047_v19  ;;  %v1049_v49 = vmul.f32 1.442695, %v1967_v20  ;;  %v1971_v50 = vsub.f32 %v1917_v26, %v1004_v47  ;;  %1063 = vadd.xlane.f32.xlu1 %v1532_v21 }
 0x5aa   :  { %1073 = vadd.xlane.f32.xlu0 %v1534_v48  ;;  %v1536_v52 = vpop.eup %1535 }
 0x5ab   :  { %1545 = vpow2.f32 %v1049_v49  ;;  %v1051_v51 = vmul.f32 1.442695, %v1971_v50 }
 0x5ad   :  { %v1538_v22 = vpop.eup %1537  ;;  %1547 = vpow2.f32 %v1051_v51  ;;  %1075 = vadd.xlane.f32.xlu1 %v1536_v52 }
 0x5ae   :  { %1069 = vadd.xlane.f32.xlu0 %v1538_v22  ;;  %v1540_v23 = vpop.eup %1539 }
 0x5b1   :  { %v1542_v53 = vpop.eup %1541  ;;  %1071 = vadd.xlane.f32.xlu1 %v1540_v23 }
 0x5b2   :  { %1077 = vadd.xlane.f32.xlu0 %v1542_v53 }
 0x5b3   :  { %v1544_v24 = vpop.eup %1543 }
 0x5b5   :  { %v1546_v25 = vpop.eup %1545  ;;  %1079 = vadd.xlane.f32.xlu1 %v1544_v24 }
 0x5b6   :  { %1081 = vadd.xlane.f32.xlu0 %v1546_v25 }
 0x5b7   :  { %v1548_v26 = vpop.eup %1547 }
 0x5b9   :  { %1083 = vadd.xlane.f32.xlu1 %v1548_v26 }
 0x626   :  { %v1058_v27 = vpop.xlane.xlu0 %1057 }
 0x627   :  { %1549 = vlog2.f32 %v1058_v27 }
 0x62a   :  { %v1060_v29 = vpop.xlane.xlu1 %1059  ;;  %v1054_v31 = vpop.xlane.xlu0 %1053 }
 0x62b   :  { %1551 = vlog2.f32 %v1060_v29 }
 0x62c   :  { %1553 = vlog2.f32 %v1054_v31 }
 0x62e   :  { %v1056_v32 = vpop.xlane.xlu1 %1055 }
 0x62f   :  { %1555 = vlog2.f32 %v1056_v32  ;;  %v1066_v33 = vpop.xlane.xlu0 %1065 }
 0x630   :  { %1557 = vlog2.f32 %v1066_v33 }
 0x631   :  { %v1550_v35 = vpop.eup %1549 }
 0x632   :  { %v1090_v37 = vmul.f32 0.6931472, %v1550_v35  ;;  %v1068_v38 = vpop.xlane.xlu1 %1067 }
 0x633   :  { %1559 = vlog2.f32 %v1068_v38  ;;  %v1062_v39 = vpop.xlane.xlu0 %1061 }
 0x634   :  { %v1119_v41 = vsub.f32 %v1921_v28, %v1090_v37  ;;  %1561 = vlog2.f32 %v1062_v39 }
 0x635   :  { %v1552_v43 = vpop.eup %1551 }
 0x636   :  { %v1554_v44 = vpop.eup %1553  ;;  %1135 = vst [vmem:[#allocation11 + $0x10] sm:$0xff] %v1119_v41  ;;  %v1092_v45 = vmul.f32 0.6931472, %v1552_v43  ;;  %v1064_v54 = vpop.xlane.xlu1 %1063 }
 0x637   :  { %v1086_v55 = vmul.f32 0.6931472, %v1554_v44  ;;  %1563 = vlog2.f32 %v1064_v54  ;;  %v1074_v58 = vpop.xlane.xlu0 %1073 }
 0x638   :  { %v1120_v59 = vsub.f32 %v1927_v34, %v1092_v45  ;;  %1565 = vlog2.f32 %v1074_v58 }
 0x639   :  { %v1556_v60 = vpop.eup %1555  ;;  %v1117_v56 = vsub.f32 %v1923_v30, %v1086_v55 }
 0x63a   :  { %v1558_v62 = vpop.eup %1557  ;;  %1136 = vst [vmem:[#allocation11 + $0x18] sm:$0xff] %v1120_v59  ;;  %v1088_v63 = vmul.f32 0.6931472, %v1556_v60  ;;  %v1076_v1 = vpop.xlane.xlu1 %1075 }
 0x63b   :  { %1133 = vst [vmem:[#allocation11] sm:$0xff] %v1117_v56  ;;  %v1098_v28 = vmul.f32 0.6931472, %v1558_v62  ;;  %1567 = vlog2.f32 %v1076_v1  ;;  %v1070_v2 = vpop.xlane.xlu0 %1069 }
 0x63c   :  { %v1118_v3 = vsub.f32 %v1929_v36, %v1088_v63  ;;  %1569 = vlog2.f32 %v1070_v2 }
 0x63d   :  { %v1560_v5 = vpop.eup %1559  ;;  %v1123_v6 = vsub.f32 %v1933_v40, %v1098_v28 }
 0x63e   :  { %v1562_v8 = vpop.eup %1561  ;;  %1134 = vst [vmem:[#allocation11 + $0x8] sm:$0xff] %v1118_v3  ;;  %v1100_v34 = vmul.f32 0.6931472, %v1560_v5  ;;  %v1072_v9 = vpop.xlane.xlu1 %1071 }
 0x63f   :  { %1139 = vst [vmem:[#allocation11 + $0x30] sm:$0xff] %v1123_v6  ;;  %v1094_v30 = vmul.f32 0.6931472, %v1562_v8  ;;  %1571 = vlog2.f32 %v1072_v9  ;;  %v1078_v10 = vpop.xlane.xlu0 %1077 }
 0x640   :  { %v1124_v11 = vsub.f32 %v1935_v42, %v1100_v34  ;;  %1573 = vlog2.f32 %v1078_v10 }
 0x641   :  { %v1564_v13 = vpop.eup %1563  ;;  %v1121_v14 = vsub.f32 %v1939_v46, %v1094_v30 }
 0x642   :  { %v1566_v15 = vpop.eup %1565  ;;  %1140 = vst [vmem:[#allocation11 + $0x38] sm:$0xff] %v1124_v11  ;;  %v1096_v36 = vmul.f32 0.6931472, %v1564_v13  ;;  %v1080_v16 = vpop.xlane.xlu1 %1079 }
 0x643   :  { %1137 = vst [vmem:[#allocation11 + $0x20] sm:$0xff] %v1121_v14  ;;  %v1106_v40 = vmul.f32 0.6931472, %v1566_v15  ;;  %1575 = vlog2.f32 %v1080_v16  ;;  %v1082_v18 = vpop.xlane.xlu0 %1081 }
 0x644   :  { %v1122_v19 = vsub.f32 %v1941_v57, %v1096_v36  ;;  %1577 = vlog2.f32 %v1082_v18 }
 0x645   :  { %v1568_v21 = vpop.eup %1567  ;;  %v1127_v47 = vsub.f32 %v1945_v61, %v1106_v40 }
 0x646   :  { %v1570_v48 = vpop.eup %1569  ;;  %1138 = vst [vmem:[#allocation11 + $0x28] sm:$0xff] %v1122_v19  ;;  %v1108_v42 = vmul.f32 0.6931472, %v1568_v21  ;;  %v1084_v49 = vpop.xlane.xlu1 %1083 }
 0x647   :  { %1143 = vst [vmem:[#allocation11 + $0x50] sm:$0xff] %v1127_v47  ;;  %v1102_v46 = vmul.f32 0.6931472, %v1570_v48  ;;  %1579 = vlog2.f32 %v1084_v49 }
 0x648   :  { %v1128_v51 = vsub.f32 %v1947_v0, %v1108_v42 }
 0x649   :  { %v1572_v52 = vpop.eup %1571  ;;  %v1125_v22 = vsub.f32 %v1951_v4, %v1102_v46 }
 0x64a   :  { %v1574_v23 = vpop.eup %1573  ;;  %1144 = vst [vmem:[#allocation11 + $0x58] sm:$0xff] %v1128_v51  ;;  %v1104_v53 = vmul.f32 0.6931472, %v1572_v52 }
 0x64b   :  { %1141 = vst [vmem:[#allocation11 + $0x40] sm:$0xff] %v1125_v22  ;;  %v1110_v57 = vmul.f32 0.6931472, %v1574_v23 }
 0x64c   :  { %v1126_v24 = vsub.f32 %v1954_v7, %v1104_v53 }
 0x64d   :  { %v1576_v61 = vpop.eup %1575  ;;  %v1129_v25 = vsub.f32 %v1959_v12, %v1110_v57 }
 0x64e   :  { %v1578_v26 = vpop.eup %1577  ;;  %1142 = vst [vmem:[#allocation11 + $0x48] sm:$0xff] %v1126_v24  ;;  %v1112_v27 = vmul.f32 0.6931472, %v1576_v61 }
 0x64f   :  { %1145 = vst [vmem:[#allocation11 + $0x60] sm:$0xff] %v1129_v25  ;;  %v1114_v29 = vmul.f32 0.6931472, %v1578_v26 }
 0x650   :  { %v1130_v0 = vsub.f32 %v1963_v17, %v1112_v27 }
 0x651   :  { %v1580_v31 = vpop.eup %1579  ;;  %v1131_v4 = vsub.f32 %v1967_v20, %v1114_v29 }
 0x652   :  { %1146 = vst [vmem:[#allocation11 + $0x68] sm:$0xff] %v1130_v0  ;;  %v1116_v32 = vmul.f32 0.6931472, %v1580_v31 }
 0x653   :  { %1147 = vst [vmem:[#allocation11 + $0x70] sm:$0xff] %v1131_v4 }
 0x654   :  { %v1132_v7 = vsub.f32 %v1971_v50, %v1116_v32 }
 0x656   :  { %1148 = vst [vmem:[#allocation11 + $0x78] sm:$0xff] %v1132_v7 }
 0x657   :  { %1702 = shalt.err (!%p1699_p2)
}
 0x658   :  { %s1703_s26 = scalar_lea.hbm %s2010_s8, 2048 }
 0x659   :  { %p1704_p3 = scmp.ne.s32.totalorder %s2010_s8, %s1703_s26  ;;  %p1707_p4 = scmp.lt.u32.totalorder %s1703_s26, %s2010_s8 }
 0x65b   :  { %p1709_p5 = pnand %p1707_p4, %p1704_p3 }
 0x65d   :  { %1712 = shalt.err (!%p1709_p5)
}
 0x65e   :  { %s1729_s0 = smov 128   ;;  %s1730_s9 = smov 8  }
 0x65f   :  { %1160 = dma.vmem_to_hbm [thread:$0]  %s1155_s22, 2048, %s2010_s8, [#allocation4], %s1729_s0, %s1729_s0, %s1730_s9  }
 0x660   :  { %1719 = dma.done.wait [#allocation4], 2048  }
 0x661   :  { %1720 = vsyncadd [#allocation4], 4294965248 }
 0x662   :  { %1164 = vsyncpa [#allocation3], 1 }
 0x663   :  { %1165 = vsyncpa [#allocation6], 1 }
 0x664   :  { %1166 = vsyncpa [#allocation9], 1 }
 0x665   :  { %1167 = vsyncpa [#allocation4], 1 }

</bundles_post_ra>
